<compile_context>
chip_gen: v5e
topology: v5e:2x2
jax: 0.10.0
libtpu: 0.0.40
codegen_flags: <defaults>
</compile_context>

<pallas_src>
import math
import functools

import jax
import jax.numpy as jnp
from jax.experimental import pallas as pl
from jax.experimental.pallas import tpu as pltpu


_QBOUND = 127.0  # 8-bit symmetric bound (2^(8-1) - 1)


# -----------------------------------------------------------------------------
# Host-side (once per weight set) helpers
# -----------------------------------------------------------------------------
def _reorder_ifog(w):
    """Reorder the 4H gate axis from PyTorch (i, f, g, o) to (i, f, o, g)."""
    i, f, g, o = jnp.split(w, 4, axis=0)
    return jnp.concatenate([i, f, o, g], axis=0)


def _quantize_weight_rows(w):
    """Per-row symmetric 8-bit quant of a [4H, K] weight.

    Returns integer-valued quantized weights (f32 values in [-127, 127]) and the
    per-row dequant factor amax/127 (zero rows -> q = 0, dequant ~ 0, matching the
    zero-amax handling of the original fake quantizer)."""
    amax = jnp.max(jnp.abs(w), axis=1, keepdims=True)            # [4H, 1]
    scale = _QBOUND / jnp.maximum(amax, 1e-24)
    q = jnp.clip(jnp.round(w * scale), -_QBOUND, _QBOUND)
    dequant = amax / _QBOUND
    return q, dequant[:, 0]                                      # [4H, K], [4H]


# -----------------------------------------------------------------------------
# Kernel
# -----------------------------------------------------------------------------
def _quant_lstm_cell_kernel(x_ref, hx_ref, cx_ref,
                            qwih_t_ref, qwhh_t_ref,
                            dq_ih_ref, dq_hh_ref, bias_ref,
                            out_ref, *, hidden_size):
    H = hidden_size
    x = x_ref[...]
    hx = hx_ref[...]
    cx = cx_ref[...]

    def quant_act(v):
        # Per-tensor symmetric 8-bit fake quant; return integer values (exact in
        # bf16) and the per-tensor dequant scalar amax/127.
        amax = jnp.max(jnp.abs(v))
        safe = jnp.maximum(amax, 1e-24)
        q = jnp.clip(jnp.round(v * (_QBOUND / safe)), -_QBOUND, _QBOUND)
        return q.astype(jnp.bfloat16), safe / _QBOUND

    qx, dx = quant_act(x)     # [Bp, I] bf16 integers, scalar
    qh, dh = quant_act(hx)    # [Bp, H] bf16 integers, scalar

    # Integer-in-bf16 matmuls on the MXU, f32 accumulation (exact).
    g_ih = jnp.dot(qx, qwih_t_ref[...], preferred_element_type=jnp.float32)
    g_hh = jnp.dot(qh, qwhh_t_ref[...], preferred_element_type=jnp.float32)

    # Per-column dequant fused with the (unquantized) bias add.
    gates = (g_ih * (dx * dq_ih_ref[...])
             + g_hh * (dh * dq_hh_ref[...])
             + bias_ref[...])                                    # [Bp, 4H]

    # Gate order is (i, f, o, g): one contiguous sigmoid, one tanh.
    ifo = jax.nn.sigmoid(gates[:, :3 * H])
    g_g = jnp.tanh(gates[:, 3 * H:])
    i_g = ifo[:, 0 * H:1 * H]
    f_g = ifo[:, 1 * H:2 * H]
    o_g = ifo[:, 2 * H:3 * H]

    cy = f_g * cx + i_g * g_g
    hy = o_g * jnp.tanh(cy)

    # Single lane-dense store: [Bp, 2H] = (hy | cy).
    out_ref[...] = jnp.concatenate([hy, cy], axis=1).astype(out_ref.dtype)


# -----------------------------------------------------------------------------
# Wrapper
# -----------------------------------------------------------------------------
@jax.jit
def quant_lstm_cell(x, hx, cx, w_ih, w_hh, b_ih=None, b_hh=None):
    """x: [B, I]; hx/cx: [B, H]; w_ih: [4H, I]; w_hh: [4H, H]; b_*: [4H] or None."""
    B, I = x.shape
    H = hx.shape[1]
    assert w_ih.shape == (4 * H, I) and w_hh.shape == (4 * H, H)

    if b_ih is None:
        b_ih = jnp.zeros((4 * H,), jnp.float32)
    if b_hh is None:
        b_hh = jnp.zeros((4 * H,), jnp.float32)

    # --- weight-side preprocessing (amortized across calls / timesteps) ---
    w_ih_r = _reorder_ifog(w_ih)                     # (i,f,o,g) row order
    w_hh_r = _reorder_ifog(w_hh)
    bias_r = _reorder_ifog(b_ih + b_hh).reshape(1, 4 * H).astype(jnp.float32)

    q_ih, dq_ih = _quantize_weight_rows(w_ih_r)      # [4H, I], [4H]
    q_hh, dq_hh = _quantize_weight_rows(w_hh_r)      # [4H, H], [4H]

    qwih_t = q_ih.T.astype(jnp.bfloat16)             # [I, 4H] integer-valued bf16
    qwhh_t = q_hh.T.astype(jnp.bfloat16)             # [H, 4H]
    dq_ih = dq_ih.reshape(1, 4 * H).astype(jnp.float32)
    dq_hh = dq_hh.reshape(1, 4 * H).astype(jnp.float32)

    # --- pad batch up to the 8-sublane granularity (zero rows don't change amax) ---
    Bp = max(8, ((B + 7) // 8) * 8)
    pad = Bp - B
    if pad:
        zpad = lambda a: jnp.pad(a, ((0, pad), (0, 0)))
        xp, hxp, cxp = zpad(x), zpad(hx), zpad(cx)
    else:
        xp, hxp, cxp = x, hx, cx

    kernel = functools.partial(_quant_lstm_cell_kernel, hidden_size=H)
    vmem = pl.BlockSpec(memory_space=pltpu.MemorySpace.VMEM)

    out = pl.pallas_call(
        kernel,
        out_shape=jax.ShapeDtypeStruct((Bp, 2 * H), x.dtype),
        in_specs=[vmem] * 8,
        out_specs=vmem,
    )(xp, hxp, cxp, qwih_t, qwhh_t, dq_ih, dq_hh, bias_r)

    hy = out[:B, :H]
    cy = out[:B, H:]
    return hy, cy


# -----------------------------------------------------------------------------
# Pure-JAX reference (original PyTorch gate order / fake-quant formulation)
# -----------------------------------------------------------------------------
def _reference(x, hx, cx, w_ih, w_hh, b_ih, b_hh):
    def fq_t(v):
        amax = jnp.max(jnp.abs(v))
        s = _QBOUND / jnp.maximum(amax, 1e-24)
        q = jnp.clip(jnp.round(v * s), -_QBOUND, _QBOUND) / s
        return jnp.where(amax > 0.0, q, jnp.zeros_like(v))

    def fq_row(w):  # per-row of [4H, in]
        amax = jnp.max(jnp.abs(w), axis=1, keepdims=True)
        s = _QBOUND / jnp.maximum(amax, 1e-24)
        q = jnp.clip(jnp.round(w * s), -_QBOUND, _QBOUND) / s
        return jnp.where(amax > 0.0, q, jnp.zeros_like(w))

    hi = jax.lax.Precision.HIGHEST
    gates = (jnp.dot(fq_t(x), fq_row(w_ih).T, precision=hi) + b_ih
             + jnp.dot(fq_t(hx), fq_row(w_hh).T, precision=hi) + b_hh)
    H = hx.shape[1]
    i = jax.nn.sigmoid(gates[:, :H])
    f = jax.nn.sigmoid(gates[:, H:2 * H])
    g = jnp.tanh(gates[:, 2 * H:3 * H])
    o = jax.nn.sigmoid(gates[:, 3 * H:])
    cy = f * cx + i * g
    hy = o * jnp.tanh(cy)
    return hy, cy


if __name__ == "__main__":
    # Small shapes consistent with the module's forward.
    batch, input_size, hidden_size = 2, 32, 32

    key = jax.random.PRNGKey(0)
    k_x, k_h, k_c, k_wih, k_whh, k_bih, k_bhh = jax.random.split(key, 7)

    # Deterministic parameter init mirroring reset_parameters(): U(-stdv, stdv)
    stdv = 1.0 / math.sqrt(hidden_size)
    uni = lambda k, shape: jax.random.uniform(k, shape, jnp.float32, -stdv, stdv)

    w_ih = uni(k_wih, (4 * hidden_size, input_size))
    w_hh = uni(k_whh, (4 * hidden_size, hidden_size))
    b_ih = uni(k_bih, (4 * hidden_size,))
    b_hh = uni(k_bhh, (4 * hidden_size,))

    x = jax.random.normal(k_x, (batch, input_size), jnp.float32)
    hx = jax.random.normal(k_h, (batch, hidden_size), jnp.float32)
    cx = jax.random.normal(k_c, (batch, hidden_size), jnp.float32)

    hy, cy = quant_lstm_cell(x, hx, cx, w_ih, w_hh, b_ih, b_hh)
    jax.block_until_ready((hy, cy))

    hy_ref, cy_ref = _reference(x, hx, cx, w_ih, w_hh, b_ih, b_hh)
    assert jnp.allclose(hy, hy_ref, atol=1e-5, rtol=1e-5), \
        float(jnp.max(jnp.abs(hy - hy_ref)))
    assert jnp.allclose(cy, cy_ref, atol=1e-5, rtol=1e-5), \
        float(jnp.max(jnp.abs(cy - cy_ref)))

    print("KERNEL_OK")
</pallas_src>

<mosaic_0001>
module attributes {stable_mosaic.version = 11 : i64} {
  func.func @_quant_lstm_cell_kernel(%arg0: memref<8x32xf32, #tpu.memory_space<vmem>>, %arg1: memref<8x32xf32, #tpu.memory_space<vmem>>, %arg2: memref<8x32xf32, #tpu.memory_space<vmem>>, %arg3: memref<32x128xbf16, #tpu.memory_space<vmem>>, %arg4: memref<32x128xbf16, #tpu.memory_space<vmem>>, %arg5: memref<1x128xf32, #tpu.memory_space<vmem>>, %arg6: memref<1x128xf32, #tpu.memory_space<vmem>>, %arg7: memref<1x128xf32, #tpu.memory_space<vmem>>, %arg8: memref<8x64xf32, #tpu.memory_space<vmem>>) attributes {dimension_semantics = [], scalar_prefetch = 0 : i64, scratch_operands = 0 : i64, tpu.core_type = #tpu.core_type<tc>} {
    %c0 = arith.constant 0 : index
    %c0_0 = arith.constant 0 : index
    %0 = vector.load %arg0[%c0, %c0_0] : memref<8x32xf32, #tpu.memory_space<vmem>>, vector<8x32xf32>
    %c0_1 = arith.constant 0 : index
    %c0_2 = arith.constant 0 : index
    %1 = vector.load %arg1[%c0_1, %c0_2] : memref<8x32xf32, #tpu.memory_space<vmem>>, vector<8x32xf32>
    %c0_3 = arith.constant 0 : index
    %c0_4 = arith.constant 0 : index
    %2 = vector.load %arg2[%c0_3, %c0_4] : memref<8x32xf32, #tpu.memory_space<vmem>>, vector<8x32xf32>
    %3 = math.absf %0 : vector<8x32xf32>
    %4 = vector.shape_cast %3 : vector<8x32xf32> to vector<1x8x32xf32>
    %cst = arith.constant dense<0xFF800000> : vector<1xf32>
    %5 = vector.multi_reduction <maximumf>, %4, %cst [1, 2] : vector<1x8x32xf32> to vector<1xf32>
    %6 = vector.shape_cast %5 : vector<1xf32> to vector<1x1x1xf32>
    %7 = vector.extract %6[0, 0, 0] : f32 from vector<1x1x1xf32>
    %cst_5 = arith.constant 1.000000e-24 : f32
    %8 = arith.maximumf %7, %cst_5 : f32
    %cst_6 = arith.constant 1.270000e+02 : f32
    %9 = arith.divf %cst_6, %8 : f32
    %10 = vector.broadcast %9 : f32 to vector<8x32xf32>
    %11 = arith.mulf %0, %10 : vector<8x32xf32>
    %12 = math.roundeven %11 : vector<8x32xf32>
    %cst_7 = arith.constant -1.270000e+02 : f32
    %cst_8 = arith.constant 1.270000e+02 : f32
    %13 = vector.broadcast %cst_7 : f32 to vector<8x32xf32>
    %14 = arith.maximumf %13, %12 : vector<8x32xf32>
    %15 = vector.broadcast %cst_8 : f32 to vector<8x32xf32>
    %16 = arith.minimumf %15, %14 : vector<8x32xf32>
    %17 = arith.truncf %16 : vector<8x32xf32> to vector<8x32xbf16>
    %cst_9 = arith.constant 1.270000e+02 : f32
    %18 = arith.divf %8, %cst_9 : f32
    %19 = math.absf %1 : vector<8x32xf32>
    %20 = vector.shape_cast %19 : vector<8x32xf32> to vector<1x8x32xf32>
    %cst_10 = arith.constant dense<0xFF800000> : vector<1xf32>
    %21 = vector.multi_reduction <maximumf>, %20, %cst_10 [1, 2] : vector<1x8x32xf32> to vector<1xf32>
    %22 = vector.shape_cast %21 : vector<1xf32> to vector<1x1x1xf32>
    %23 = vector.extract %22[0, 0, 0] : f32 from vector<1x1x1xf32>
    %cst_11 = arith.constant 1.000000e-24 : f32
    %24 = arith.maximumf %23, %cst_11 : f32
    %cst_12 = arith.constant 1.270000e+02 : f32
    %25 = arith.divf %cst_12, %24 : f32
    %26 = vector.broadcast %25 : f32 to vector<8x32xf32>
    %27 = arith.mulf %1, %26 : vector<8x32xf32>
    %28 = math.roundeven %27 : vector<8x32xf32>
    %cst_13 = arith.constant -1.270000e+02 : f32
    %cst_14 = arith.constant 1.270000e+02 : f32
    %29 = vector.broadcast %cst_13 : f32 to vector<8x32xf32>
    %30 = arith.maximumf %29, %28 : vector<8x32xf32>
    %31 = vector.broadcast %cst_14 : f32 to vector<8x32xf32>
    %32 = arith.minimumf %31, %30 : vector<8x32xf32>
    %33 = arith.truncf %32 : vector<8x32xf32> to vector<8x32xbf16>
    %cst_15 = arith.constant 1.270000e+02 : f32
    %34 = arith.divf %24, %cst_15 : f32
    %c0_16 = arith.constant 0 : index
    %c0_17 = arith.constant 0 : index
    %35 = vector.load %arg3[%c0_16, %c0_17] : memref<32x128xbf16, #tpu.memory_space<vmem>>, vector<32x128xbf16>
    %cst_18 = arith.constant dense<0.000000e+00> : vector<8x128xf32>
    %36 = tpu.matmul %17, %35, %cst_18 {dimension_numbers = #tpu.dot_dimension_numbers<[1], [0], [0], [1], [0, 0, 1, 1], [], []>} : vector<8x32xbf16>, vector<32x128xbf16>, vector<8x128xf32> -> vector<8x128xf32>
    %c0_19 = arith.constant 0 : index
    %c0_20 = arith.constant 0 : index
    %37 = vector.load %arg4[%c0_19, %c0_20] : memref<32x128xbf16, #tpu.memory_space<vmem>>, vector<32x128xbf16>
    %cst_21 = arith.constant dense<0.000000e+00> : vector<8x128xf32>
    %38 = tpu.matmul %33, %37, %cst_21 {dimension_numbers = #tpu.dot_dimension_numbers<[1], [0], [0], [1], [0, 0, 1, 1], [], []>} : vector<8x32xbf16>, vector<32x128xbf16>, vector<8x128xf32> -> vector<8x128xf32>
    %c0_22 = arith.constant 0 : index
    %c0_23 = arith.constant 0 : index
    %39 = vector.load %arg5[%c0_22, %c0_23] : memref<1x128xf32, #tpu.memory_space<vmem>>, vector<1x128xf32>
    %40 = vector.broadcast %18 : f32 to vector<1x128xf32>
    %41 = arith.mulf %40, %39 : vector<1x128xf32>
    %42 = vector.broadcast %41 : vector<1x128xf32> to vector<8x128xf32>
    %43 = arith.mulf %36, %42 : vector<8x128xf32>
    %c0_24 = arith.constant 0 : index
    %c0_25 = arith.constant 0 : index
    %44 = vector.load %arg6[%c0_24, %c0_25] : memref<1x128xf32, #tpu.memory_space<vmem>>, vector<1x128xf32>
    %45 = vector.broadcast %34 : f32 to vector<1x128xf32>
    %46 = arith.mulf %45, %44 : vector<1x128xf32>
    %47 = vector.broadcast %46 : vector<1x128xf32> to vector<8x128xf32>
    %48 = arith.mulf %38, %47 : vector<8x128xf32>
    %49 = arith.addf %43, %48 : vector<8x128xf32>
    %c0_26 = arith.constant 0 : index
    %c0_27 = arith.constant 0 : index
    %50 = vector.load %arg7[%c0_26, %c0_27] : memref<1x128xf32, #tpu.memory_space<vmem>>, vector<1x128xf32>
    %51 = vector.broadcast %50 : vector<1x128xf32> to vector<8x128xf32>
    %52 = arith.addf %49, %51 : vector<8x128xf32>
    %53 = vector.extract_strided_slice %52 {offsets = [0, 0], sizes = [8, 96], strides = [1, 1]} : vector<8x128xf32> to vector<8x96xf32>
    %54 = arith.negf %53 : vector<8x96xf32>
    %55 = math.exp %54 : vector<8x96xf32>
    %cst_28 = arith.constant 1.000000e+00 : f32
    %56 = vector.broadcast %cst_28 : f32 to vector<8x96xf32>
    %57 = arith.addf %56, %55 : vector<8x96xf32>
    %58 = arith.divf %56, %57 : vector<8x96xf32>
    %59 = vector.extract_strided_slice %52 {offsets = [0, 96], sizes = [8, 32], strides = [1, 1]} : vector<8x128xf32> to vector<8x32xf32>
    %60 = math.tanh %59 : vector<8x32xf32>
    %61 = vector.extract_strided_slice %58 {offsets = [0, 0], sizes = [8, 32], strides = [1, 1]} : vector<8x96xf32> to vector<8x32xf32>
    %62 = vector.extract_strided_slice %58 {offsets = [0, 32], sizes = [8, 32], strides = [1, 1]} : vector<8x96xf32> to vector<8x32xf32>
    %63 = vector.extract_strided_slice %58 {offsets = [0, 64], sizes = [8, 32], strides = [1, 1]} : vector<8x96xf32> to vector<8x32xf32>
    %64 = arith.mulf %62, %2 : vector<8x32xf32>
    %65 = arith.mulf %61, %60 : vector<8x32xf32>
    %66 = arith.addf %64, %65 : vector<8x32xf32>
    %67 = math.tanh %66 : vector<8x32xf32>
    %68 = arith.mulf %63, %67 : vector<8x32xf32>
    %69 = tpu.concatenate %68, %66 in 1 : vector<8x32xf32>, vector<8x32xf32> -> vector<8x64xf32>
    %c0_29 = arith.constant 0 : index
    %c0_30 = arith.constant 0 : index
    %70 = vector.load %arg8[%c0_29, %c0_30] : memref<8x64xf32, #tpu.memory_space<vmem>>, vector<8x64xf32>
    tpu.vector_store %arg8[%c0_29, %c0_30], %69 {strides = array<i32>} : memref<8x64xf32, #tpu.memory_space<vmem>>, vector<8x64xf32>,
    return
  }
}

</mosaic_0001>

<bundles_post_ra>
// kernel: quant_lstm_cell.1
= control target key start
LH: loop header
LB: loop body
LE: loop exit
PB: predicated region body
PF: predicated region fallthrough
CT: control target
= control target key end

     0   :  { %vm34_vm0 = vcmask 261120   ;;  %v328_v13 = vmov 127.0   ;;  %s444_s0 = inlined_call_operand.vmem [shape: f32[8,32], index: 0, kind: input, shape index: {}]   ;;  %s445_s1 = inlined_call_operand.vmem [shape: f32[8,32], index: 1, kind: input, shape index: {}]   ;;  %s446_s3 = inlined_call_operand.vmem [shape: bf16[32,128], index: 3, kind: input, shape index: {}]   ;;  %s447_s7 = inlined_call_operand.vmem [shape: f32[1,128], index: 7, kind: input, shape index: {}]   ;;  %s448_s4 = inlined_call_operand.vmem [shape: bf16[32,128], index: 4, kind: input, shape index: {}]   ;;  %s449_s5 = inlined_call_operand.vmem [shape: f32[1,128], index: 5, kind: input, shape index: {}]   ;;  %s450_s6 = inlined_call_operand.vmem [shape: f32[1,128], index: 6, kind: input, shape index: {}]   ;;  %s451_s2 = inlined_call_operand.vmem [shape: f32[8,32], index: 2, kind: input, shape index: {}]   ;;  %s452_s8 = inlined_call_operand.vmem [shape: f32[8,64], index: 8, kind: output, shape index: {}]  }
   0x1   :  { %v380_v0 = vld [vmem:[%s444_s0] sm:$0xff]  ;;  %314 = vrcp.f32 %v328_v13  ;;  %v280_v38 = vld [vmem:[%s446_s3 + $0x8] sm:$0xff] }
   0x2   :  { %v33_v1 = vand.u32 2147483647, %v380_v0  ;;  %v386_v2 = vld [vmem:[%s445_s1] sm:$0xff]  ;;  %s329_s1 = smov 1e-24   ;;  %147 = vmatpush.bf16.msra.mxu0 %v280_v38  ;;  %v282_v62 = vld [vmem:[%s448_s4 + $0x8] sm:$0xff] }
   0x3   :  { %v78_v4 = vand.u32 2147483647, %v386_v2  ;;  %v279_v39 = vld [vmem:[%s446_s3] sm:$0xff]  ;;  %179 = vmatpush.bf16.msra.mxu1 %v282_v62 }
   0x4   :  { %v35_v3 = vsel %vm34_vm0, %v33_v1, -inf  ;;  %v281_v63 = vld [vmem:[%s448_s4] sm:$0xff] }
   0x5   :  { %36 = vmax.xlane.f32.xlu0 %v35_v3  ;;  %v79_v5 = vsel %vm34_vm0, %v78_v4, -inf }
   0x6   :  { %148 = vmatpush.bf16.msra.mxu0 %v279_v39 }
   0x7   :  { %v315_v15 = vpop.eup %314  ;;  %180 = vmatpush.bf16.msra.mxu1 %v281_v63 }
   0x8   :  { %v70_v18 = vmul.f32 127.0, %v315_v15  ;;  %vm74_vm2 = vweird.f32 %v315_v15 }
   0xa   :  { %v71_v20 = vsub.f32 1.0, %v70_v18 }
   0xc   :  { %v72_v24 = vmul.f32 %v315_v15, %v71_v20 }
   0xd   :  { %80 = vmax.xlane.f32.xlu0 %v79_v5 }
   0xe   :  { %v73_v30 = vadd.f32 %v315_v15, %v72_v24  ;;  %v313_v24 = vld [vmem:[%s447_s7] ss:$0 sm:$0xff] }
  0x10   :  { %v75_v35 = vsel %vm74_vm2, %v315_v15, %v73_v30 }
  0x78   :  { %v37_v6 = vpop.xlane.xlu0 %36 }
  0x79   :  { %v38_v7 = vrot.slane %v37_v6, 4 }
  0x7b   :  { %v39_v8 = vmax.f32 %v37_v6, %v38_v7 }
  0x7d   :  { %v40_v9 = vrot.slane %v39_v8, 2 }
  0x7f   :  { %v41_v10 = vmax.f32 %v39_v8, %v40_v9 }
  0x80   :  { %v81_v14 = vpop.xlane.xlu0 %80 }
  0x81   :  { %v42_v11 = vrot.slane %v41_v10, 1  ;;  %v82_v16 = vrot.slane %v81_v14, 4 }
  0x83   :  { %v43_v12 = vmax.f32 %v41_v10, %v42_v11  ;;  %v83_v19 = vmax.f32 %v81_v14, %v82_v16 }
  0x85   :  { %283 = vpush %v43_v12  ;;  %v84_v21 = vrot.slane %v83_v19, 2 }
  0x87   :  { %v85_v26 = vmax.f32 %v83_v19, %v84_v21  ;;  %v193_v19 = vld [vmem:[%s450_s6] sm:$0x1] }
  0x89   :  { %v86_v32 = vrot.slane %v85_v26, 1 }
  0x8b   :  { %v87_v37 = vmax.f32 %v85_v26, %v86_v32 }
  0xb6   :  { %s284_s0 = spop %283 }
  0xb7   :  { %s392_s9 = smax.f32 %s329_s1, %s284_s0 }
  0xb8   :  { %v46_v17 = vstv %s392_s9 }
  0xb9   :  { %316 = vrcp.f32 %v46_v17  ;;  %v58_v27 = vand.u32 2147483648, %v46_v17  ;;  %v56_v29 = vand.u32 2147483647, %v46_v17  ;;  %vm52_vm3 = vweird.f32 %v46_v17 }
  0xbb   :  { %v59_v33 = vor.u32 1.1754944e-38, %v58_v27  ;;  %vm57_vm5 = vcmp.eq.f32.partialorder %v56_v29, 8.507059e+37  ;;  %v32_v29 = vld [vmem:[%s451_s2] sm:$0xff]  ;;  %s331_s2 = smov 64  }
  0xbf   :  { %v317_v22 = vpop.eup %316 }
  0xc0   :  { %v48_v23 = vmul.f32 %v317_v22, %v46_v17  ;;  %vm53_vm1 = vweird.f32 %v317_v22 }
  0xc1   :  { %vm54_vm4 = vmor %vm52_vm3, %vm53_vm1  ;;  %vm252_vm1 = vcmask 523264  }
  0xc2   :  { %v49_v25 = vsub.f32 1.0, %v48_v23 }
  0xc4   :  { %v50_v28 = vmul.f32 %v317_v22, %v49_v25 }
  0xc6   :  { %v51_v31 = vadd.f32 %v317_v22, %v50_v28 }
  0xc8   :  { %v55_v34 = vsel %vm54_vm4, %v317_v22, %v51_v31 }
  0xc9   :  { %v60_v36 = vsel %vm57_vm5, %v59_v33, %v55_v34 }
  0xca   :  { %285 = vpush %v60_v36 }
  0xcb   :  { %295 = vpush %v75_v35 }
  0xcc   :  { %297 = vpush %v87_v37 }
  0xfb   :  { %s286_s14 = spop %285 }
  0xfc   :  { %s62_s15 = smul.f32 127.0, %s286_s14  ;;  %s401_s16 = spop %295 }
  0xfd   :  { %s298_s17 = spop %297  ;;  %s77_s4 = smul.f32 %s401_s16, %s392_s9 }
  0xfe   :  { %v63_v40 = vstv %s62_s15  ;;  %s404_s18 = smax.f32 %s329_s1, %s298_s17 }
  0xff   :  { %v64_v41 = vmul.f32 %v63_v40, %v380_v0  ;;  %v90_v42 = vstv %s404_s18  ;;  %s121_s19 = smul.f32 %s401_s16, %s404_s18  ;;  %v187_v12 = vstv %s77_s4 }
 0x100   :  { %318 = vrcp.f32 %v90_v42  ;;  %v102_v54 = vand.u32 2147483648, %v90_v42  ;;  %v100_v56 = vand.u32 2147483647, %v90_v42  ;;  %vm96_vm8 = vweird.f32 %v90_v42 }
 0x101   :  { %v289_v43 = vcvt.f32.s32 %v64_v41  ;;  %v287_v45 = vand.u32 2147483647, %v64_v41  ;;  %v292_v47 = vand.u32 2147483648, %v64_v41  ;;  %v194_v18 = vstv %s121_s19 }
 0x102   :  { %v103_v59 = vor.u32 1.1754944e-38, %v102_v54  ;;  %vm101_vm10 = vcmp.eq.f32.partialorder %v100_v56, 8.507059e+37  ;;  %v195_v20 = vmul.f32 %v194_v18, %v193_v19 }
 0x103   :  { %v290_v44 = vcvt.s32.f32 %v289_v43  ;;  %vm288_vm6 = vcmp.lt.f32.partialorder %v287_v45, 8388608.0 }
 0x104   :  { %v197_v21 = vperm.slane %v195_v20, 0 }
 0x105   :  { %v291_v46 = vand.u32 2147483647, %v290_v44 }
 0x106   :  { %v319_v48 = vpop.eup %318 }
 0x107   :  { %v92_v49 = vmul.f32 %v319_v48, %v90_v42  ;;  %v293_v50 = vor.u32 %v292_v47, %v291_v46  ;;  %vm97_vm7 = vweird.f32 %v319_v48 }
 0x108   :  { %vm98_vm9 = vmor %vm96_vm8, %vm97_vm7 }
 0x109   :  { %v93_v51 = vsub.f32 1.0, %v92_v49  ;;  %v294_v52 = vsel %vm288_vm6, %v293_v50, %v64_v41 }
 0x10a   :  { %v258_v53 = vclamps-f32 %v294_v52, 127.0 }
 0x10b   :  { %v94_v55 = vmul.f32 %v319_v48, %v93_v51 }
 0x10c   :  { %v68_v57 = vpack.c.bf16 %v258_v53, %v258_v53 }
 0x10d   :  { %v95_v58 = vadd.f32 %v319_v48, %v94_v55 }
 0x10e   :  { %268 = vmatmul.msk.bf16.vlgmr.msra.gmra.mxu0 %vm34_vm0, %v68_v57 }
 0x10f   :  { %v99_v60 = vsel %vm98_vm9, %v319_v48, %v95_v58 }
 0x110   :  { %v104_v61 = vsel %vm101_vm10, %v103_v59, %v99_v60 }
 0x111   :  { %299 = vpush %v104_v61 }
 0x142   :  { %s300_s23 = spop %299 }
 0x143   :  { %s106_s24 = smul.f32 127.0, %s300_s23 }
 0x145   :  { %v107_v0 = vstv %s106_s24 }
 0x146   :  { %v108_v1 = vmul.f32 %v107_v0, %v386_v2  ;;  %v186_v2 = vld [vmem:[%s449_s5] sm:$0x1]  ;;  %s330_s5 = smov 32  }
 0x147   :  { %v188_v13 = vmul.f32 %v187_v12, %v186_v2 }
 0x148   :  { %v303_v3 = vcvt.f32.s32 %v108_v1  ;;  %v301_v5 = vand.u32 2147483647, %v108_v1  ;;  %v306_v7 = vand.u32 2147483648, %v108_v1 }
 0x149   :  { %v190_v14 = vperm.slane %v188_v13, 0 }
 0x14a   :  { %v304_v4 = vcvt.s32.f32 %v303_v3  ;;  %vm302_vm11 = vcmp.lt.f32.partialorder %v301_v5, 8388608.0 }
 0x14c   :  { %v305_v6 = vand.u32 2147483647, %v304_v4 }
 0x14e   :  { %v307_v8 = vor.u32 %v306_v7, %v305_v6 }
 0x150   :  { %v308_v9 = vsel %vm302_vm11, %v307_v8, %v108_v1 }
 0x151   :  { %v259_v10 = vclamps-f32 %v308_v9, 127.0 }
 0x153   :  { %v112_v11 = vpack.c.bf16 %v259_v10, %v259_v10 }
 0x155   :  { %277 = vmatmul.msk.bf16.vlgmr.msra.gmra.mxu1 %vm34_vm0, %v112_v11 }
 0x18b   :  { %v150_v15 = vpop.f32.mrf.mxu0 }
 0x18c   :  { %v192_v16 = vmul.f32 %v190_v14, %v150_v15 }
 0x193   :  { %v152_v17 = vpop.f32.mrf.mxu0 }
 0x1d2   :  { %v182_v22 = vpop.f32.mrf.mxu1 }
 0x1d3   :  { %v199_v23 = vmul.f32 %v197_v21, %v182_v22 }
 0x1d5   :  { %v200_v25 = vadd.f32 %v199_v23, %v192_v16 }
 0x1d7   :  { %v205_v26 = vadd.f32 %v313_v24, %v200_v25 }
 0x1d9   :  { %320 = vtanh.f32 %v205_v26  ;;  %v278_v30 = vmul.f32 -1.442695, %v205_v26 }
 0x1da   :  { %v184_v27 = vpop.f32.mrf.mxu1 }
 0x1db   :  { %322 = vpow2.f32 %v278_v30 }
 0x1df   :  { %v321_v28 = vpop.eup %320 }
 0x1e0   :  { %232 = vrot.lane.b32.xlu1 %v321_v28, %s330_s5 }
 0x1e1   :  { %v323_v31 = vpop.eup %322 }
 0x1e2   :  { %v209_v32 = vadd.f32 1.0, %v323_v31 }
 0x1e4   :  { %324 = vrcp.f32 %v209_v32  ;;  %v221_v38 = vand.u32 2147483648, %v209_v32  ;;  %vm215_vm13 = vweird.f32 %v209_v32  ;;  %v219_v39 = vand.u32 2147483647, %v209_v32 }
 0x1e6   :  { %v222_v41 = vor.u32 1.1754944e-38, %v221_v38  ;;  %vm220_vm15 = vcmp.eq.f32.partialorder %v219_v39, 8.507059e+37 }
 0x1e8   :  { %227 = vrot.lane.b32.xlu1 %v32_v29, %s330_s5 }
 0x1ea   :  { %v325_v33 = vpop.eup %324 }
 0x1eb   :  { %v211_v34 = vmul.f32 %v325_v33, %v209_v32  ;;  %vm216_vm12 = vweird.f32 %v325_v33 }
 0x1ec   :  { %vm217_vm14 = vmor %vm215_vm13, %vm216_vm12 }
 0x1ed   :  { %v212_v35 = vsub.f32 1.0, %v211_v34 }
 0x1ef   :  { %v213_v36 = vmul.f32 %v325_v33, %v212_v35 }
 0x1f1   :  { %v214_v37 = vadd.f32 %v325_v33, %v213_v36 }
 0x1f3   :  { %v218_v40 = vsel %vm217_vm14, %v325_v33, %v214_v37 }
 0x1f4   :  { %v223_v43 = vsel %vm220_vm15, %v222_v41, %v218_v40 }
 0x252   :  { %v233_v42 = vpop.permute.xlu1 %232 }
 0x253   :  { %v235_v44 = vmul.f32 %v233_v42, %v223_v43 }
 0x255   :  { %237 = vrot.lane.b32.xlu2 %v235_v44, %s330_s5 }
 0x25a   :  { %v228_v45 = vpop.permute.xlu1 %227 }
 0x25b   :  { %v230_v46 = vmul.f32 %v228_v45, %v223_v43 }
 0x2af   :  { %v238_v47 = vpop.permute.xlu2 %237 }
 0x2b0   :  { %v240_v48 = vadd.f32 %v238_v47, %v230_v46 }
 0x2b2   :  { %326 = vtanh.f32 %v240_v48 }
 0x2b8   :  { %v327_v49 = vpop.eup %326 }
 0x2b9   :  { %243 = vrot.lane.b32.xlu2 %v327_v49, %s330_s5 }
 0x313   :  { %v244_v50 = vpop.permute.xlu2 %243 }
 0x314   :  { %v246_v51 = vmul.f32 %v244_v50, %v223_v43 }
 0x316   :  { %248 = vrot.lane.b32.xlu0 %v246_v51, %s331_s2 }
 0x388   :  { %v249_v52 = vpop.permute.xlu0 %248 }
 0x389   :  { %v251_v53 = vsel %vm34_vm0, %v249_v52, %v240_v48 }
 0x38a   :  { %253 = vst.msk [vmem:[%s452_s8] sm:$0xff] %vm252_vm1, %v251_v53 }

</bundles_post_ra>
